<compile_context>
chip_gen: v7x
topology: tpu7x:2x2x1
jax: 0.10.0
libtpu: 0.0.40
codegen_flags: <defaults>
</compile_context>

<pallas_src>
import functools

import jax
import jax.numpy as jnp
from jax.experimental import pallas as pl
from jax.experimental.pallas import tpu as pltpu


# --------------------------------------------------------------------------- #
# Kernel
# --------------------------------------------------------------------------- #
def _two_layer_ff_kernel(x_ref, w1_ref, b1_ref, w2_ref, b2_ref, w3_ref, b3_ref,
                         out_ref, a1_ref, a2_ref):
    # Matmuls on the MXU (f32 accumulation), bias-add + tanh in f32 on VPU/EUP.
    x = x_ref[...]

    z1 = jnp.dot(x, w1_ref[...], preferred_element_type=jnp.float32) + b1_ref[...]
    a1 = jnp.tanh(z1)
    a1_ref[...] = a1.astype(a1_ref.dtype)

    z2 = jnp.dot(a1.astype(w2_ref.dtype), w2_ref[...],
                 preferred_element_type=jnp.float32) + b2_ref[...]
    a2 = jnp.tanh(z2)
    a2_ref[...] = a2.astype(a2_ref.dtype)

    z3 = jnp.dot(a2.astype(w3_ref.dtype), w3_ref[...],
                 preferred_element_type=jnp.float32) + b3_ref[...]
    out_ref[...] = z3.astype(out_ref.dtype)


# --------------------------------------------------------------------------- #
# Helpers
# --------------------------------------------------------------------------- #
def _round_up(n, m):
    return ((n + m - 1) // m) * m


def _cdiv(a, b):
    return -(-a // b)


def _vmem_capacity_bytes():
    # Best-effort physical VMEM query; conservative (v7x-sized) fallback.
    try:
        return int(pltpu.get_tpu_info().vmem_capacity_bytes)
    except Exception:
        return 64 << 20


def _xla_forward_from_packed(x, packed, structure, act_dtype):
    # Plain XLA path using the already-packed (transposed/padded/cast) params.
    w1t, b1p, w2t, b2p, w3t, b3p = packed
    ni, n1, n2, no = structure
    cdt = w1t.dtype
    ni_p = w1t.shape[0]
    x_p = jnp.pad(x, ((0, 0), (0, ni_p - ni))).astype(cdt)
    z1 = jnp.dot(x_p, w1t, preferred_element_type=jnp.float32) + b1p
    a1 = jnp.tanh(z1)
    z2 = jnp.dot(a1.astype(cdt), w2t, preferred_element_type=jnp.float32) + b2p
    a2 = jnp.tanh(z2)
    z3 = jnp.dot(a2.astype(cdt), w3t, preferred_element_type=jnp.float32) + b3p
    return (z3[:, :no].astype(act_dtype),
            [a1[:, :n1].astype(act_dtype), a2[:, :n2].astype(act_dtype)])


# --------------------------------------------------------------------------- #
# One-time weight packing (hoisted out of the hot path)
# --------------------------------------------------------------------------- #
def pack_two_layer_ff_params(w1, b1, w2, b2, w3, b3, *, compute_dtype=jnp.bfloat16):
    """One-time weight prep — do NOT call per step.

    Transposes PyTorch-style (out_features, in_features) weights to (in, out),
    zero-pads every feature dim to a multiple of 128 (lane-dense, exact because
    tanh(0)=0 and padded rows/cols/biases are zero) and casts matmul operands to
    `compute_dtype` (accumulation/bias/tanh stay f32 in-kernel).

    Returns (packed_arrays, structure) to pass to two_layer_ff_packed().
    """
    cdt = jnp.dtype(compute_dtype)
    n1, ni = w1.shape
    n2 = w2.shape[0]
    no = w3.shape[0]
    ni_p, n1_p, n2_p, no_p = (_round_up(d, 128) for d in (ni, n1, n2, no))

    w1t = jnp.pad(w1.T, ((0, ni_p - ni), (0, n1_p - n1))).astype(cdt)
    w2t = jnp.pad(w2.T, ((0, n1_p - n1), (0, n2_p - n2))).astype(cdt)
    w3t = jnp.pad(w3.T, ((0, n2_p - n2), (0, no_p - no))).astype(cdt)
    b1p = jnp.pad(b1.reshape(1, n1), ((0, 0), (0, n1_p - n1))).astype(jnp.float32)
    b2p = jnp.pad(b2.reshape(1, n2), ((0, 0), (0, n2_p - n2))).astype(jnp.float32)
    b3p = jnp.pad(b3.reshape(1, no), ((0, 0), (0, no_p - no))).astype(jnp.float32)

    return (w1t, b1p, w2t, b2p, w3t, b3p), (ni, n1, n2, no)


# --------------------------------------------------------------------------- #
# Hot path: Pallas call on pre-packed params
# --------------------------------------------------------------------------- #
@functools.partial(jax.jit, static_argnames=("structure", "block_b", "out_dtype"))
def two_layer_ff_packed(x, packed, *, structure, block_b=512, out_dtype=None):
    """Pallas TwoLayerFF.forward on pre-packed params.  Returns (out, [a1, a2])."""
    w1t, b1p, w2t, b2p, w3t, b3p = packed
    ni, n1, n2, no = structure
    cdt = w1t.dtype
    act_dtype = jnp.dtype(out_dtype) if out_dtype is not None else jnp.dtype(x.dtype)

    B = x.shape[0]
    ni_p, n1_p = w1t.shape
    n2_p = w2t.shape[1]
    no_p = w3t.shape[1]

    itm_c = cdt.itemsize
    itm_o = act_dtype.itemsize
    sub = 8 if min(itm_c, itm_o) >= 4 else 16   # sublane multiple for the batch tile

    # --- VMEM budget -------------------------------------------------------
    # Resident (single-buffered, pl.Buffered(1)): three weights + biases.
    w_bytes = ((ni_p * n1_p + n1_p * n2_p + n2_p * no_p) * itm_c
               + (n1_p + n2_p + no_p) * 4)
    # Per batch-row pipelined bytes: double-buffered x tile, double-buffered
    # out/a1/a2 tiles, plus the in-kernel f32 intermediates (z1,a1,z2,a2,z3)
    # and the bf16 re-casts that live in compiler scratch.
    per_row = (2 * ni_p * itm_c
               + 2 * (n1_p + n2_p + no_p) * itm_o
               + 4 * (2 * n1_p + 2 * n2_p + no_p)
               + (n1_p + n2_p) * itm_c)

    cap = max(_vmem_capacity_bytes(), 32 << 20)
    usable = int(cap * 0.8)

    if w_bytes + sub * per_row > usable:
        # TODO(synk): stream weight N/K tiles with an inner pltpu.emit_pipeline
        # (activations resident) instead of falling back to XLA when the three
        # resident weights exceed the VMEM budget (v7x, hidden >~ 2K in bf16).
        return _xla_forward_from_packed(x, packed, structure, act_dtype)

    # --- Batch tile --------------------------------------------------------
    # Cap so the batch grid has >= 2 steps when possible (keeps both v7x
    # TensorCores busy and lets the pipeline hide x DMA / activation writeback).
    two_step_cap = max(sub, _round_up(_cdiv(B, 2), sub))
    blk_budget = max(sub, ((usable - w_bytes) // per_row) // sub * sub)
    blk = max(sub, min(_round_up(block_b, sub), blk_budget, two_step_cap))
    B_p = _round_up(B, blk)
    grid = (B_p // blk,)

    x_p = jnp.pad(x, ((0, B_p - B), (0, ni_p - ni))).astype(cdt)

    vmem_limit = int(min(max(w_bytes + blk * per_row + (8 << 20), 32 << 20),
                         int(cap * 0.9)))

    # Resident operands: constant block index across the grid + single buffer.
    def resident_spec(shape):
        return pl.BlockSpec(shape, lambda i: (0, 0), pipeline_mode=pl.Buffered(1))

    flops = 2 * B_p * (ni_p * n1_p + n1_p * n2_p + n2_p * no_p)
    transcendentals = B_p * (n1_p + n2_p)
    bytes_accessed = (
        B_p * ni_p * itm_c
        + (ni_p * n1_p + n1_p * n2_p + n2_p * no_p) * itm_c
        + (n1_p + n2_p + no_p) * 4
        + B_p * (n1_p + n2_p + no_p) * itm_o
    )

    out_p, a1_p, a2_p = pl.pallas_call(
        _two_layer_ff_kernel,
        out_shape=(
            jax.ShapeDtypeStruct((B_p, no_p), act_dtype),
            jax.ShapeDtypeStruct((B_p, n1_p), act_dtype),
            jax.ShapeDtypeStruct((B_p, n2_p), act_dtype),
        ),
        grid_spec=pltpu.PrefetchScalarGridSpec(
            num_scalar_prefetch=0,
            grid=grid,
            in_specs=[
                pl.BlockSpec((blk, ni_p), lambda i: (i, 0)),   # x tile (pipelined)
                resident_spec((ni_p, n1_p)),                   # fc1.weight (pre-T)
                resident_spec((1, n1_p)),                      # fc1.bias
                resident_spec((n1_p, n2_p)),                   # fc2.weight (pre-T)
                resident_spec((1, n2_p)),                      # fc2.bias
                resident_spec((n2_p, no_p)),                   # fc3.weight (pre-T)
                resident_spec((1, no_p)),                      # fc3.bias
            ],
            out_specs=[
                pl.BlockSpec((blk, no_p), lambda i: (i, 0)),   # out
                pl.BlockSpec((blk, n1_p), lambda i: (i, 0)),   # a1
                pl.BlockSpec((blk, n2_p), lambda i: (i, 0)),   # a2
            ],
        ),
        compiler_params=pltpu.CompilerParams(
            dimension_semantics=("parallel",),
            vmem_limit_bytes=vmem_limit,
        ),
        cost_estimate=pl.CostEstimate(
            flops=flops,
            transcendentals=transcendentals,
            bytes_accessed=bytes_accessed,
        ),
    )(x_p, w1t, b1p, w2t, b2p, w3t, b3p)

    out = out_p[:B, :no]
    a1 = a1_p[:B, :n1]
    a2 = a2_p[:B, :n2]
    return out, [a1, a2]


# --------------------------------------------------------------------------- #
# Convenience wrapper (packs every call — prefer the packed API for inference)
# --------------------------------------------------------------------------- #
def two_layer_ff(x, w1, b1, w2, b2, w3, b3, *, compute_dtype=jnp.bfloat16,
                 block_b=512, out_dtype=None, small_problem_xla_fallback=True):
    """Convenience path.  For repeated inference, call pack_two_layer_ff_params()
    once and use two_layer_ff_packed() — this wrapper re-packs weights per call."""
    packed, structure = pack_two_layer_ff_params(
        w1, b1, w2, b2, w3, b3, compute_dtype=compute_dtype)
    ni, n1, n2, no = structure
    act_dtype = jnp.dtype(out_dtype) if out_dtype is not None else jnp.dtype(x.dtype)
    if small_problem_xla_fallback and max(ni, n1, n2, no) <= 128 and x.shape[0] <= 256:
        # Padding to 128 lanes would make >90% of the MXU work zero-FLOPs and the
        # fixed per-call overhead dominates; XLA's fused matmul wins at this scale.
        return _xla_forward_from_packed(x, packed, structure, act_dtype)
    return two_layer_ff_packed(x, packed, structure=structure,
                               block_b=block_b, out_dtype=out_dtype)


# --------------------------------------------------------------------------- #
# Demo / self-check
# --------------------------------------------------------------------------- #
def _init_linear(key, out_features, in_features, dtype=jnp.float32):
    # Deterministic init matching PyTorch nn.Linear's U(-1/sqrt(fan_in), 1/sqrt(fan_in)).
    kw, kb = jax.random.split(key)
    bound = 1.0 / (in_features ** 0.5)
    w = jax.random.uniform(kw, (out_features, in_features), dtype,
                           minval=-bound, maxval=bound)
    b = jax.random.uniform(kb, (out_features,), dtype, minval=-bound, maxval=bound)
    return w, b


if __name__ == "__main__":
    # structure = [ni, n_l_1, n_l_2, no]; activF = tanh
    structure = [16, 32, 32, 8]
    batch = 8

    key = jax.random.PRNGKey(0)
    kx, k1, k2, k3 = jax.random.split(key, 4)

    x = jax.random.normal(kx, (batch, structure[0]), jnp.float32)
    w1, b1 = _init_linear(k1, structure[1], structure[0])
    w2, b2 = _init_linear(k2, structure[2], structure[1])
    w3, b3 = _init_linear(k3, structure[3], structure[2])

    # Pure-JAX reference of the same forward pass.
    a1_ref = jnp.tanh(x @ w1.T + b1)
    a2_ref = jnp.tanh(a1_ref @ w2.T + b2)
    out_ref = a2_ref @ w3.T + b3

    # --- Pallas path, f32 operands: tight check. ---
    packed32, dims = pack_two_layer_ff_params(w1, b1, w2, b2, w3, b3,
                                              compute_dtype=jnp.float32)
    out32, (a1_32, a2_32) = two_layer_ff_packed(x, packed32, structure=dims)
    jax.block_until_ready((out32, a1_32, a2_32))
    assert out32.shape == (batch, structure[-1])
    assert a1_32.shape == (batch, structure[1])
    assert a2_32.shape == (batch, structure[2])
    assert jnp.allclose(a1_32, a1_ref, atol=1e-5), "a1 mismatch (f32)"
    assert jnp.allclose(a2_32, a2_ref, atol=1e-5), "a2 mismatch (f32)"
    assert jnp.allclose(out32, out_ref, atol=1e-5), "out mismatch (f32)"

    # --- Pallas path, default bf16 operands / f32 accumulation: loose check. ---
    packed_bf, dims_bf = pack_two_layer_ff_params(w1, b1, w2, b2, w3, b3)
    out_bf, (a1_bf, a2_bf) = two_layer_ff_packed(x, packed_bf, structure=dims_bf)
    jax.block_until_ready((out_bf, a1_bf, a2_bf))
    assert jnp.allclose(a1_bf, a1_ref, atol=5e-2), "a1 mismatch (bf16 operands)"
    assert jnp.allclose(a2_bf, a2_ref, atol=5e-2), "a2 mismatch (bf16 operands)"
    assert jnp.allclose(out_bf, out_ref, atol=5e-2), "out mismatch (bf16 operands)"

    # --- Convenience wrapper (small-problem XLA fallback at these shapes). ---
    out_c, (a1_c, a2_c) = two_layer_ff(x, w1, b1, w2, b2, w3, b3,
                                       compute_dtype=jnp.float32)
    jax.block_until_ready((out_c, a1_c, a2_c))
    assert jnp.allclose(out_c, out_ref, atol=5e-2), "out mismatch (fallback)"

    print("KERNEL_OK")
</pallas_src>

<mosaic_0001>
module attributes {stable_mosaic.version = 11 : i64} {
  func.func @_two_layer_ff_kernel(%arg0: i32, %arg1: memref<8x128xf32, #tpu.memory_space<vmem>>, %arg2: memref<128x128xf32, #tpu.memory_space<vmem>>, %arg3: memref<1x128xf32, #tpu.memory_space<vmem>>, %arg4: memref<128x128xf32, #tpu.memory_space<vmem>>, %arg5: memref<1x128xf32, #tpu.memory_space<vmem>>, %arg6: memref<128x128xf32, #tpu.memory_space<vmem>>, %arg7: memref<1x128xf32, #tpu.memory_space<vmem>>, %arg8: memref<8x128xf32, #tpu.memory_space<vmem>>, %arg9: memref<8x128xf32, #tpu.memory_space<vmem>>, %arg10: memref<8x128xf32, #tpu.memory_space<vmem>>) attributes {dimension_semantics = [#tpu.dimension_semantics<parallel>], iteration_bounds = array<i64: 1>, scalar_prefetch = 0 : i64, scratch_operands = 0 : i64, tpu.core_type = #tpu.core_type<tc>, window_params = [{transform_indices = @transform_0, window_bounds = array<i64: 8, 128>}, {pipeline_mode = #tpu.pipeline_mode<synchronous>, transform_indices = @transform_1, window_bounds = array<i64: 128, 128>}, {pipeline_mode = #tpu.pipeline_mode<synchronous>, transform_indices = @transform_2, window_bounds = array<i64: 1, 128>}, {pipeline_mode = #tpu.pipeline_mode<synchronous>, transform_indices = @transform_3, window_bounds = array<i64: 128, 128>}, {pipeline_mode = #tpu.pipeline_mode<synchronous>, transform_indices = @transform_4, window_bounds = array<i64: 1, 128>}, {pipeline_mode = #tpu.pipeline_mode<synchronous>, transform_indices = @transform_5, window_bounds = array<i64: 128, 128>}, {pipeline_mode = #tpu.pipeline_mode<synchronous>, transform_indices = @transform_6, window_bounds = array<i64: 1, 128>}, {transform_indices = @transform_7, window_bounds = array<i64: 8, 128>}, {transform_indices = @transform_8, window_bounds = array<i64: 8, 128>}, {transform_indices = @transform_9, window_bounds = array<i64: 8, 128>}]} {
    %c0 = arith.constant 0 : index
    %c0_0 = arith.constant 0 : index
    %0 = vector.load %arg1[%c0, %c0_0] : memref<8x128xf32, #tpu.memory_space<vmem>>, vector<8x128xf32>
    %c0_1 = arith.constant 0 : index
    %c0_2 = arith.constant 0 : index
    %1 = vector.load %arg2[%c0_1, %c0_2] : memref<128x128xf32, #tpu.memory_space<vmem>>, vector<128x128xf32>
    %cst = arith.constant dense<0.000000e+00> : vector<8x128xf32>
    %2 = tpu.matmul %0, %1, %cst {dimension_numbers = #tpu.dot_dimension_numbers<[1], [0], [0], [1], [0, 0, 1, 1], [], []>} : vector<8x128xf32>, vector<128x128xf32>, vector<8x128xf32> -> vector<8x128xf32>
    %c0_3 = arith.constant 0 : index
    %c0_4 = arith.constant 0 : index
    %3 = vector.load %arg3[%c0_3, %c0_4] : memref<1x128xf32, #tpu.memory_space<vmem>>, vector<1x128xf32>
    %4 = vector.broadcast %3 : vector<1x128xf32> to vector<8x128xf32>
    %5 = arith.addf %2, %4 : vector<8x128xf32>
    %6 = math.tanh %5 : vector<8x128xf32>
    %c0_5 = arith.constant 0 : index
    %c0_6 = arith.constant 0 : index
    %7 = vector.load %arg9[%c0_5, %c0_6] : memref<8x128xf32, #tpu.memory_space<vmem>>, vector<8x128xf32>
    tpu.vector_store %arg9[%c0_5, %c0_6], %6 {strides = array<i32>} : memref<8x128xf32, #tpu.memory_space<vmem>>, vector<8x128xf32>,
    %c0_7 = arith.constant 0 : index
    %c0_8 = arith.constant 0 : index
    %8 = vector.load %arg4[%c0_7, %c0_8] : memref<128x128xf32, #tpu.memory_space<vmem>>, vector<128x128xf32>
    %cst_9 = arith.constant dense<0.000000e+00> : vector<8x128xf32>
    %9 = tpu.matmul %6, %8, %cst_9 {dimension_numbers = #tpu.dot_dimension_numbers<[1], [0], [0], [1], [0, 0, 1, 1], [], []>} : vector<8x128xf32>, vector<128x128xf32>, vector<8x128xf32> -> vector<8x128xf32>
    %c0_10 = arith.constant 0 : index
    %c0_11 = arith.constant 0 : index
    %10 = vector.load %arg5[%c0_10, %c0_11] : memref<1x128xf32, #tpu.memory_space<vmem>>, vector<1x128xf32>
    %11 = vector.broadcast %10 : vector<1x128xf32> to vector<8x128xf32>
    %12 = arith.addf %9, %11 : vector<8x128xf32>
    %13 = math.tanh %12 : vector<8x128xf32>
    %c0_12 = arith.constant 0 : index
    %c0_13 = arith.constant 0 : index
    %14 = vector.load %arg10[%c0_12, %c0_13] : memref<8x128xf32, #tpu.memory_space<vmem>>, vector<8x128xf32>
    tpu.vector_store %arg10[%c0_12, %c0_13], %13 {strides = array<i32>} : memref<8x128xf32, #tpu.memory_space<vmem>>, vector<8x128xf32>,
    %c0_14 = arith.constant 0 : index
    %c0_15 = arith.constant 0 : index
    %15 = vector.load %arg6[%c0_14, %c0_15] : memref<128x128xf32, #tpu.memory_space<vmem>>, vector<128x128xf32>
    %cst_16 = arith.constant dense<0.000000e+00> : vector<8x128xf32>
    %16 = tpu.matmul %13, %15, %cst_16 {dimension_numbers = #tpu.dot_dimension_numbers<[1], [0], [0], [1], [0, 0, 1, 1], [], []>} : vector<8x128xf32>, vector<128x128xf32>, vector<8x128xf32> -> vector<8x128xf32>
    %c0_17 = arith.constant 0 : index
    %c0_18 = arith.constant 0 : index
    %17 = vector.load %arg7[%c0_17, %c0_18] : memref<1x128xf32, #tpu.memory_space<vmem>>, vector<1x128xf32>
    %18 = vector.broadcast %17 : vector<1x128xf32> to vector<8x128xf32>
    %19 = arith.addf %16, %18 : vector<8x128xf32>
    %c0_19 = arith.constant 0 : index
    %c0_20 = arith.constant 0 : index
    %20 = vector.load %arg8[%c0_19, %c0_20] : memref<8x128xf32, #tpu.memory_space<vmem>>, vector<8x128xf32>
    tpu.vector_store %arg8[%c0_19, %c0_20], %19 {strides = array<i32>} : memref<8x128xf32, #tpu.memory_space<vmem>>, vector<8x128xf32>,
    return
  }
  func.func @transform_0(%arg0: i32) -> (i32, i32) {
    %c0_i32 = arith.constant 0 : i32
    %c0_i32_0 = arith.constant 0 : i32
    return %arg0, %c0_i32 : i32, i32
  }
  func.func @transform_1(%arg0: i32) -> (i32, i32) {
    %c0_i32 = arith.constant 0 : i32
    %c0_i32_0 = arith.constant 0 : i32
    %c0_i32_1 = arith.constant 0 : i32
    return %c0_i32, %c0_i32_0 : i32, i32
  }
  func.func @transform_2(%arg0: i32) -> (i32, i32) {
    %c0_i32 = arith.constant 0 : i32
    %c0_i32_0 = arith.constant 0 : i32
    %c0_i32_1 = arith.constant 0 : i32
    return %c0_i32, %c0_i32_0 : i32, i32
  }
  func.func @transform_3(%arg0: i32) -> (i32, i32) {
    %c0_i32 = arith.constant 0 : i32
    %c0_i32_0 = arith.constant 0 : i32
    %c0_i32_1 = arith.constant 0 : i32
    return %c0_i32, %c0_i32_0 : i32, i32
  }
  func.func @transform_4(%arg0: i32) -> (i32, i32) {
    %c0_i32 = arith.constant 0 : i32
    %c0_i32_0 = arith.constant 0 : i32
    %c0_i32_1 = arith.constant 0 : i32
    return %c0_i32, %c0_i32_0 : i32, i32
  }
  func.func @transform_5(%arg0: i32) -> (i32, i32) {
    %c0_i32 = arith.constant 0 : i32
    %c0_i32_0 = arith.constant 0 : i32
    %c0_i32_1 = arith.constant 0 : i32
    return %c0_i32, %c0_i32_0 : i32, i32
  }
  func.func @transform_6(%arg0: i32) -> (i32, i32) {
    %c0_i32 = arith.constant 0 : i32
    %c0_i32_0 = arith.constant 0 : i32
    %c0_i32_1 = arith.constant 0 : i32
    return %c0_i32, %c0_i32_0 : i32, i32
  }
  func.func @transform_7(%arg0: i32) -> (i32, i32) {
    %c0_i32 = arith.constant 0 : i32
    %c0_i32_0 = arith.constant 0 : i32
    return %arg0, %c0_i32 : i32, i32
  }
  func.func @transform_8(%arg0: i32) -> (i32, i32) {
    %c0_i32 = arith.constant 0 : i32
    %c0_i32_0 = arith.constant 0 : i32
    return %arg0, %c0_i32 : i32, i32
  }
  func.func @transform_9(%arg0: i32) -> (i32, i32) {
    %c0_i32 = arith.constant 0 : i32
    %c0_i32_0 = arith.constant 0 : i32
    return %arg0, %c0_i32 : i32, i32
  }
}

</mosaic_0001>

<bundles_post_ra>
// kernel: two_layer_ff_packed.1
= control target key start
LH: loop header
LB: loop body
LE: loop exit
PB: predicated region body
PF: predicated region fallthrough
CT: control target
= control target key end

     0   :  { %15 = vsyncpa [#allocation3], 0  ;;  %s977_s0 = inlined_call_operand.vmem [shape: f32[8,128], index: 0, kind: input, shape index: {}]   ;;  %s978_s1 = inlined_call_operand.hbm [shape: f32[128,128], index: 1, kind: input, shape index: {}]   ;;  %s979_s2 = inlined_call_operand.vmem [shape: f32[1,128], index: 2, kind: input, shape index: {}]   ;;  %s980_s3 = inlined_call_operand.hbm [shape: f32[128,128], index: 3, kind: input, shape index: {}]   ;;  %s981_s4 = inlined_call_operand.vmem [shape: f32[1,128], index: 4, kind: input, shape index: {}]   ;;  %s982_s5 = inlined_call_operand.hbm [shape: f32[128,128], index: 5, kind: input, shape index: {}]   ;;  %s983_s6 = inlined_call_operand.vmem [shape: f32[1,128], index: 6, kind: input, shape index: {}]   ;;  %s984_s7 = inlined_call_operand.hbm [shape: f32[8,128], index: 7, kind: output, shape index: {0}]   ;;  %s985_s8 = inlined_call_operand.hbm [shape: f32[8,128], index: 8, kind: output, shape index: {1}]   ;;  %s986_s9 = inlined_call_operand.hbm [shape: f32[8,128], index: 9, kind: output, shape index: {2}]  }
   0x1   :  { %16 = vsyncpa [#allocation6], 0 }
   0x2   :  { %17 = vsyncpa [#allocation4], 0 }
   0x3   :  { %18 = vsyncpa [#allocation10], 0  ;;  %s786_s30 = smov [#allocation5]   ;;  %s787_s11 = smov [#allocation2]  }
   0x4   :  { %s40_s10 = sshll.u32 %s786_s30, 4  ;;  %s26_s12 = sshll.u32 %s787_s11, 4  ;;  %s41_s10 = int_to_ptr.vmem [resolvable:$true] %s40_s10  ;;  %s847_s12 = int_to_ptr.vmem [resolvable:$true] %s26_s12 }
   0x5   :  { %s646_s15 = scalar_lea.hbm %s980_s3, 2048 }
   0x6   :  { %p647_p0 = scmp.ne.s32.totalorder %s980_s3, %s646_s15  ;;  %p650_p1 = scmp.lt.u32.totalorder %s646_s15, %s980_s3 }
   0x8   :  { %p652_p2 = pnand %p650_p1, %p647_p0 }
   0xa   :  { %655 = shalt.err (!%p652_p2)
}
   0xb   :  { %s656_s20 = scalar_lea.vmem %s41_s10, 2048  ;;  %p661_p4 = scmp.lt.s32.totalorder %s41_s10, %s41_s10 }
   0xc   :  { %p657_p3 = scmp.ne.s32.totalorder %s41_s10, %s656_s20  ;;  %p662_p5 = scmp.lt.s32.totalorder %s656_s20, %s656_s20 }
   0xe   :  { %p663_p6 = por %p662_p5, %p661_p4 }
  0x10   :  { %p664_p7 = pnand %p663_p6, %p657_p3 }
  0x12   :  { %667 = shalt.err (!%p664_p7)
}
  0x13   :  { %s788_s21 = smov 128   ;;  %s789_s22 = smov 8  }
  0x14   :  { %46 = dma.hbm_to_vmem [thread:$0]  %s980_s3, 2048, %s41_s10, [#allocation6], %s788_s21, %s788_s21, %s789_s22  }
  0x15   :  { %s668_s27 = scalar_lea.hbm %s978_s1, 2048 }
  0x16   :  { %p669_p8 = scmp.ne.s32.totalorder %s978_s1, %s668_s27  ;;  %p672_p9 = scmp.lt.u32.totalorder %s668_s27, %s978_s1 }
  0x18   :  { %p674_p10 = pnand %p672_p9, %p669_p8 }
  0x1a   :  { %677 = shalt.err (!%p674_p10)
}
  0x1b   :  { %s678_s13 = scalar_lea.vmem %s847_s12, 2048  ;;  %p683_p12 = scmp.lt.s32.totalorder %s847_s12, %s847_s12 }
  0x1c   :  { %p679_p11 = scmp.ne.s32.totalorder %s847_s12, %s678_s13  ;;  %p684_p13 = scmp.lt.s32.totalorder %s678_s13, %s678_s13 }
  0x1e   :  { %p685_p0 = por %p684_p13, %p683_p12 }
  0x20   :  { %p686_p1 = pnand %p685_p0, %p679_p11 }
  0x22   :  { %689 = shalt.err (!%p686_p1)
}
  0x23   :  { %32 = dma.hbm_to_vmem [thread:$0]  %s978_s1, 2048, %s847_s12, [#allocation3], %s788_s21, %s788_s21, %s789_s22  }
  0x24   :  { %s790_s14 = smov [#allocation7]   ;;  %s690_s18 = scalar_lea.hbm %s982_s5, 2048 }
  0x25   :  { %s54_s15 = sshll.u32 %s790_s14, 4  ;;  %p691_p2 = scmp.ne.s32.totalorder %s982_s5, %s690_s18  ;;  %s55_s15 = int_to_ptr.vmem [resolvable:$true] %s54_s15 }
  0x26   :  { %p694_p3 = scmp.lt.u32.totalorder %s690_s18, %s982_s5 }
  0x28   :  { %p696_p4 = pnand %p694_p3, %p691_p2 }
  0x2a   :  { %699 = shalt.err (!%p696_p4)
}
  0x2b   :  { %s700_s25 = scalar_lea.vmem %s55_s15, 2048  ;;  %p705_p6 = scmp.lt.s32.totalorder %s55_s15, %s55_s15 }
  0x2c   :  { %p701_p5 = scmp.ne.s32.totalorder %s55_s15, %s700_s25  ;;  %p706_p7 = scmp.lt.s32.totalorder %s700_s25, %s700_s25 }
  0x2e   :  { %p707_p8 = por %p706_p7, %p705_p6 }
  0x30   :  { %p708_p9 = pnand %p707_p8, %p701_p5 }
  0x32   :  { %711 = shalt.err (!%p708_p9)
}
  0x33   :  { %60 = dma.hbm_to_vmem [thread:$0]  %s982_s5, 2048, %s55_s15, [#allocation6], %s788_s21, %s788_s21, %s789_s22  }
  0x34   :  { %778 = dma.done.wait [#allocation3], 2048  }
  0x35   :  { %779 = vsyncadd [#allocation3], 4294965248 }
  0x36   :  { %780 = dma.done.wait [#allocation6], 4096  }
  0x37   :  { %781 = vsyncadd [#allocation6], 4294963200  ;;  %v791_v0 = vmov 0.0|0.0   ;;  %vm792_vm0 = vmmov 0   ;;  %v793_v1 = vmov 0.0   ;;  %v73_v2 = vld [vmem:[#allocation2] sm:$0xff] }
  0x38   :  { %559 = vmatprep.subr.bf16.mxu0 %v791_v0  ;;  %486 = vmatprep.mubr.msk.f32.mxu0 %vm792_vm0, %v793_v1  ;;  %v74_v3 = vld [vmem:[#allocation2 + $0x8] sm:$0xff]  ;;  %v75_v4 = vld [vmem:[#allocation2 + $0x10] sm:$0xff]  ;;  %v76_v6 = vld [vmem:[#allocation2 + $0x18] sm:$0xff]  ;;  %s794_s27 = smov [#allocation9]  }
  0x39   :  { %583 = vmatprep.subr.bf16.mxu1 %v791_v0  ;;  %521 = vmatprep.mubr.msk.f32.mxu1 %vm792_vm0, %v793_v1  ;;  %v560_v5 = vpack.c.bf16 %v74_v3, %v73_v2  ;;  %v563_v7 = vpack.c.bf16 %v76_v6, %v75_v4  ;;  %v77_v8 = vld [vmem:[#allocation2 + $0x20] sm:$0xff]  ;;  %v78_v9 = vld [vmem:[#allocation2 + $0x28] sm:$0xff]  ;;  %v170_v12 = vld [vmem:[#allocation5 + $0x10] sm:$0xff]  ;;  %s373_s28 = sshll.u32 %s794_s27, 4  ;;  %s374_s28 = int_to_ptr.vmem [resolvable:$true] %s373_s28 }
  0x3a   :  { %v168_v10 = vld [vmem:[#allocation5] sm:$0xff]  ;;  %v169_v11 = vld [vmem:[#allocation5 + $0x8] sm:$0xff]  ;;  %v171_v13 = vld [vmem:[#allocation5 + $0x18] sm:$0xff]  ;;  %v566_v14 = vpack.c.bf16 %v78_v9, %v77_v8  ;;  %s712_s29 = scalar_lea.vmem %s374_s28, 128  ;;  %p717_p11 = scmp.lt.s32.totalorder %s374_s28, %s374_s28 }
  0x3b   :  { %561 = vmatpush3.bf16.msra.mxu0 %v560_v5  ;;  %v584_v15 = vpack.c.bf16 %v169_v11, %v168_v10  ;;  %v79_v16 = vld [vmem:[#allocation2 + $0x30] sm:$0xff]  ;;  %v80_v17 = vld [vmem:[#allocation2 + $0x38] sm:$0xff]  ;;  %v587_v18 = vpack.c.bf16 %v171_v13, %v170_v12  ;;  %v172_v19 = vld [vmem:[#allocation5 + $0x20] sm:$0xff]  ;;  %p713_p10 = scmp.ne.s32.totalorder %s374_s28, %s712_s29  ;;  %p718_p12 = scmp.lt.s32.totalorder %s712_s29, %s712_s29 }
  0x3c   :  { %562 = vmatprep.subr.bf16.mxu0 %v791_v0  ;;  %v173_v20 = vld [vmem:[#allocation5 + $0x28] sm:$0xff]  ;;  %v569_v21 = vpack.c.bf16 %v80_v17, %v79_v16  ;;  %v81_v22 = vld [vmem:[#allocation2 + $0x40] sm:$0xff]  ;;  %v174_v25 = vld [vmem:[#allocation5 + $0x30] sm:$0xff] }
  0x3d   :  { %585 = vmatpush3.bf16.msra.mxu1 %v584_v15  ;;  %v82_v23 = vld [vmem:[#allocation2 + $0x48] sm:$0xff]  ;;  %v590_v24 = vpack.c.bf16 %v173_v20, %v172_v19  ;;  %v175_v26 = vld [vmem:[#allocation5 + $0x38] sm:$0xff]  ;;  %v83_v28 = vld [vmem:[#allocation2 + $0x50] sm:$0xff]  ;;  %p719_p13 = por %p718_p12, %p717_p11 }
  0x3e   :  { %586 = vmatprep.subr.bf16.mxu1 %v791_v0  ;;  %v572_v27 = vpack.c.bf16 %v82_v23, %v81_v22  ;;  %v84_v29 = vld [vmem:[#allocation2 + $0x58] sm:$0xff]  ;;  %v593_v30 = vpack.c.bf16 %v175_v26, %v174_v25  ;;  %v176_v31 = vld [vmem:[#allocation5 + $0x40] sm:$0xff]  ;;  %v177_v32 = vld [vmem:[#allocation5 + $0x48] sm:$0xff] }
  0x3f   :  { %564 = vmatpush3.bf16.msra.mxu0 %v563_v7  ;;  %v575_v33 = vpack.c.bf16 %v84_v29, %v83_v28  ;;  %v85_v34 = vld [vmem:[#allocation2 + $0x60] sm:$0xff]  ;;  %v86_v35 = vld [vmem:[#allocation2 + $0x68] sm:$0xff]  ;;  %v596_v36 = vpack.c.bf16 %v177_v32, %v176_v31  ;;  %v87_v38 = vld [vmem:[#allocation2 + $0x70] sm:$0xff]  ;;  %p720_p0 = pnand %p719_p13, %p713_p10 }
  0x40   :  { %565 = vmatprep.subr.bf16.mxu0 %v791_v0  ;;  %v578_v37 = vpack.c.bf16 %v86_v35, %v85_v34  ;;  %v88_v39 = vld [vmem:[#allocation2 + $0x78] sm:$0xff]  ;;  %v72_v41 = vld [vmem:[%s977_s0] sm:$0xff]  ;;  %v178_v42 = vld [vmem:[#allocation5 + $0x50] sm:$0xff] }
  0x41   :  { %588 = vmatpush3.bf16.msra.mxu1 %v587_v18  ;;  %v581_v40 = vpack.c.bf16 %v88_v39, %v87_v38  ;;  %v179_v43 = vld [vmem:[#allocation5 + $0x58] sm:$0xff]  ;;  %v180_v45 = vld [vmem:[#allocation5 + $0x60] sm:$0xff]  ;;  %v181_v46 = vld [vmem:[#allocation5 + $0x68] sm:$0xff] }
  0x42   :  { %589 = vmatprep.subr.bf16.mxu1 %v791_v0  ;;  %v599_v44 = vpack.c.bf16 %v179_v43, %v178_v42  ;;  %v602_v47 = vpack.c.bf16 %v181_v46, %v180_v45  ;;  %v182_v48 = vld [vmem:[#allocation5 + $0x70] sm:$0xff]  ;;  %v183_v49 = vld [vmem:[#allocation5 + $0x78] sm:$0xff]  ;;  %v263_v51 = vld [vmem:[#allocation7] sm:$0xff] }
  0x43   :  { %567 = vmatpush3.bf16.msra.mxu0 %v566_v14  ;;  %v605_v50 = vpack.c.bf16 %v183_v49, %v182_v48  ;;  %v264_v52 = vld [vmem:[#allocation7 + $0x8] sm:$0xff]  ;;  %v265_v53 = vld [vmem:[#allocation7 + $0x10] sm:$0xff]  ;;  %v266_v55 = vld [vmem:[#allocation7 + $0x18] sm:$0xff] }
  0x44   :  { %568 = vmatprep.subr.bf16.mxu0 %v791_v0  ;;  %v608_v54 = vpack.c.bf16 %v264_v52, %v263_v51  ;;  %v611_v56 = vpack.c.bf16 %v266_v55, %v265_v53  ;;  %v267_v57 = vld [vmem:[#allocation7 + $0x20] sm:$0xff]  ;;  %v268_v58 = vld [vmem:[#allocation7 + $0x28] sm:$0xff]  ;;  %v269_v60 = vld [vmem:[#allocation7 + $0x30] sm:$0xff] }
  0x45   :  { %591 = vmatpush3.bf16.msra.mxu1 %v590_v24  ;;  %v614_v59 = vpack.c.bf16 %v268_v58, %v267_v57  ;;  %v270_v61 = vld [vmem:[#allocation7 + $0x38] sm:$0xff]  ;;  %v271_v63 = vld [vmem:[#allocation7 + $0x40] sm:$0xff]  ;;  %v273_v8 = vld [vmem:[#allocation7 + $0x50] sm:$0xff] }
  0x46   :  { %592 = vmatprep.subr.bf16.mxu1 %v791_v0  ;;  %v617_v62 = vpack.c.bf16 %v270_v61, %v269_v60  ;;  %v400_v3 = vld [vmem:[%s979_s2] ss:$0 sm:$0xff]  ;;  %v274_v9 = vld [vmem:[#allocation7 + $0x58] sm:$0xff]  ;;  %v276_v12 = vld [vmem:[#allocation7 + $0x68] sm:$0xff] }
  0x47   :  { %570 = vmatpush3.bf16.msra.mxu0 %v569_v21  ;;  %v623_v10 = vpack.c.bf16 %v274_v9, %v273_v8  ;;  %v275_v11 = vld [vmem:[#allocation7 + $0x60] sm:$0xff]  ;;  %v277_v14 = vld [vmem:[#allocation7 + $0x70] sm:$0xff]  ;;  %v278_v15 = vld [vmem:[#allocation7 + $0x78] sm:$0xff] }
  0x48   :  { %571 = vmatprep.subr.bf16.mxu0 %v791_v0  ;;  %v626_v13 = vpack.c.bf16 %v276_v12, %v275_v11  ;;  %v629_v16 = vpack.c.bf16 %v278_v15, %v277_v14  ;;  %v401_v17 = vld [vmem:[%s981_s4] ss:$0 sm:$0xff] }
  0x49   :  { %594 = vmatpush3.bf16.msra.mxu1 %v593_v30 }
  0x4a   :  { %595 = vmatprep.subr.bf16.mxu1 %v791_v0 }
  0x4b   :  { %573 = vmatpush3.bf16.msra.mxu0 %v572_v27 }
  0x4c   :  { %574 = vmatprep.subr.bf16.mxu0 %v791_v0 }
  0x4d   :  { %597 = vmatpush3.bf16.msra.mxu1 %v596_v36 }
  0x4e   :  { %598 = vmatprep.subr.bf16.mxu1 %v791_v0 }
  0x4f   :  { %576 = vmatpush3.bf16.msra.mxu0 %v575_v33 }
  0x50   :  { %577 = vmatprep.subr.bf16.mxu0 %v791_v0 }
  0x51   :  { %600 = vmatpush3.bf16.msra.mxu1 %v599_v44 }
  0x52   :  { %601 = vmatprep.subr.bf16.mxu1 %v791_v0 }
  0x53   :  { %579 = vmatpush3.bf16.msra.mxu0 %v578_v37 }
  0x54   :  { %580 = vmatprep.subr.bf16.mxu0 %v791_v0 }
  0x55   :  { %603 = vmatpush3.bf16.msra.mxu1 %v602_v47 }
  0x56   :  { %604 = vmatprep.subr.bf16.mxu1 %v791_v0 }
  0x57   :  { %582 = vmatpush3.bf16.msra.mxu0 %v581_v40 }
  0x58   :  { %607 = vmatprep.subr.bf16.mxu0 %v791_v0 }
  0x59   :  { %606 = vmatpush3.bf16.msra.mxu1 %v605_v50 }
  0x5a   :  { %487 = vmatmul.mubr.f32.vlgmr.msra.gmra.mrb[0].mxu0 %v72_v41 }
  0x5b   :  { %556 = vmatprep.mubr.msk.f32.mxu0 %vm792_vm0, %v793_v1  ;;  %609 = vmatpush3.bf16.msra.mxu0 %v608_v54  ;;  %v272_v1 = vld [vmem:[#allocation7 + $0x48] sm:$0xff] }
  0x5c   :  { %610 = vmatprep.subr.bf16.mxu0 %v791_v0  ;;  %v620_v2 = vpack.c.bf16 %v272_v1, %v271_v63 }
  0x5f   :  { %612 = vmatpush3.bf16.msra.mxu0 %v611_v56 }
  0x60   :  { %613 = vmatprep.subr.bf16.mxu0 %v791_v0 }
  0x63   :  { %615 = vmatpush3.bf16.msra.mxu0 %v614_v59 }
  0x64   :  { %616 = vmatprep.subr.bf16.mxu0 %v791_v0 }
  0x67   :  { %618 = vmatpush3.bf16.msra.mxu0 %v617_v62 }
  0x68   :  { %619 = vmatprep.subr.bf16.mxu0 %v791_v0 }
  0x6b   :  { %621 = vmatpush3.bf16.msra.mxu0 %v620_v2 }
  0x6c   :  { %622 = vmatprep.subr.bf16.mxu0 %v791_v0 }
  0x6f   :  { %624 = vmatpush3.bf16.msra.mxu0 %v623_v10 }
  0x70   :  { %625 = vmatprep.subr.bf16.mxu0 %v791_v0 }
  0x73   :  { %627 = vmatpush3.bf16.msra.mxu0 %v626_v13 }
  0x74   :  { %628 = vmatprep.subr.bf16.mxu0 %v791_v0 }
  0x77   :  { %630 = vmatpush3.bf16.msra.mxu0 %v629_v16 }
 0x12d   :  { %v162_v4 = vpop.f32.mrb[0].mxu0 }
 0x12e   :  { %v163_v5 = vadd.f32 %v400_v3, %v162_v4  ;;  %v488_v6 = vpop.f32.mrb[1].mxu0 }
 0x130   :  { %642 = vtanh.f32 %v163_v5 }
 0x13a   :  { %v643_v7 = vpop.eup %642 }
 0x13b   :  { %167 = vst [vmem:[#allocation9] sm:$0xff] %v643_v7  ;;  %522 = vmatmul.mubr.f32.vlgmr.msra.gmra.mrb[0].mxu1 %v643_v7 }
 0x20e   :  { %v257_v18 = vpop.f32.mrb[0].mxu1 }
 0x20f   :  { %v258_v19 = vadd.f32 %v401_v17, %v257_v18  ;;  %v523_v20 = vpop.f32.mrb[1].mxu1 }
 0x211   :  { %644 = vtanh.f32 %v258_v19 }
 0x21b   :  { %v645_v21 = vpop.eup %644 }
 0x21c   :  { %262 = vst [vmem:[#allocation11] sm:$0xff] %v645_v21  ;;  %557 = vmatmul.mubr.f32.vlgmr.msra.gmra.mrb[2].mxu0 %v645_v21 }
 0x21d   :  { %723 = shalt.err (!%p720_p0)
}
 0x21e   :  { %s724_s4 = scalar_lea.hbm %s985_s8, 128 }
 0x21f   :  { %p725_p1 = scmp.ne.s32.totalorder %s985_s8, %s724_s4  ;;  %p728_p2 = scmp.lt.u32.totalorder %s724_s4, %s985_s8 }
 0x221   :  { %p730_p3 = pnand %p728_p2, %p725_p1 }
 0x223   :  { %733 = shalt.err (!%p730_p3)
}
 0x224   :  { %376 = dma.vmem_to_hbm [thread:$0]  %s374_s28, 128, %s985_s8, [#allocation10]  }
 0x225   :  { %s795_s17 = smov [#allocation11]  }
 0x226   :  { %s383_s18 = sshll.u32 %s795_s17, 4  ;;  %s384_s18 = int_to_ptr.vmem [resolvable:$true] %s383_s18 }
 0x227   :  { %s734_s19 = scalar_lea.vmem %s384_s18, 128  ;;  %p739_p5 = scmp.lt.s32.totalorder %s384_s18, %s384_s18 }
 0x228   :  { %p735_p4 = scmp.ne.s32.totalorder %s384_s18, %s734_s19  ;;  %p740_p6 = scmp.lt.s32.totalorder %s734_s19, %s734_s19 }
 0x22a   :  { %p741_p7 = por %p740_p6, %p739_p5 }
 0x22c   :  { %p742_p8 = pnand %p741_p7, %p735_p4 }
 0x22e   :  { %745 = shalt.err (!%p742_p8)
}
 0x22f   :  { %s746_s24 = scalar_lea.hbm %s986_s9, 128 }
 0x230   :  { %p747_p9 = scmp.ne.s32.totalorder %s986_s9, %s746_s24  ;;  %p750_p10 = scmp.lt.u32.totalorder %s746_s24, %s986_s9 }
 0x232   :  { %p752_p11 = pnand %p750_p10, %p747_p9 }
 0x234   :  { %755 = shalt.err (!%p752_p11)
}
 0x235   :  { %386 = dma.vmem_to_hbm [thread:$0]  %s384_s18, 128, %s986_s9, [#allocation10]   ;;  %v402_v0 = vld [vmem:[%s983_s6] ss:$0 sm:$0xff] }
 0x236   :  { %s796_s2 = smov [#allocation8]  }
 0x237   :  { %s363_s26 = sshll.u32 %s796_s2, 4  ;;  %s364_s26 = int_to_ptr.vmem [resolvable:$true] %s363_s26 }
 0x238   :  { %s756_s27 = scalar_lea.vmem %s364_s26, 128  ;;  %p761_p13 = scmp.lt.s32.totalorder %s364_s26, %s364_s26 }
 0x239   :  { %p757_p12 = scmp.ne.s32.totalorder %s364_s26, %s756_s27  ;;  %p762_p0 = scmp.lt.s32.totalorder %s756_s27, %s756_s27 }
 0x23b   :  { %p763_p1 = por %p762_p0, %p761_p13 }
 0x23d   :  { %p764_p2 = pnand %p763_p1, %p757_p12 }
 0x2ef   :  { %v352_v22 = vpop.f32.mrb[2].mxu0 }
 0x2f0   :  { %v353_v23 = vadd.f32 %v402_v0, %v352_v22  ;;  %v558_v24 = vpop.f32.mrb[3].mxu0 }
 0x2f2   :  { %356 = vst [vmem:[#allocation8] sm:$0xff] %v353_v23 }
 0x2f3   :  { %767 = shalt.err (!%p764_p2)
}
 0x2f4   :  { %s768_s29 = scalar_lea.hbm %s984_s7, 128 }
 0x2f5   :  { %p769_p3 = scmp.ne.s32.totalorder %s984_s7, %s768_s29  ;;  %p772_p4 = scmp.lt.u32.totalorder %s768_s29, %s984_s7 }
 0x2f7   :  { %p774_p5 = pnand %p772_p4, %p769_p3 }
 0x2f9   :  { %777 = shalt.err (!%p774_p5)
}
 0x2fa   :  { %366 = dma.vmem_to_hbm [thread:$0]  %s364_s26, 128, %s984_s7, [#allocation4]  }
 0x2fb   :  { %782 = dma.done.wait [#allocation4], 128  }
 0x2fc   :  { %783 = vsyncadd [#allocation4], 4294967168 }
 0x2fd   :  { %784 = dma.done.wait [#allocation10], 256  }
 0x2fe   :  { %785 = vsyncadd [#allocation10], 4294967040 }
 0x2ff   :  { %396 = vsyncpa [#allocation3], 1 }
 0x300   :  { %397 = vsyncpa [#allocation6], 1 }
 0x301   :  { %398 = vsyncpa [#allocation4], 1 }
 0x302   :  { %399 = vsyncpa [#allocation10], 1 }

</bundles_post_ra>
